<compile_context>
chip_gen: v7x
topology: tpu7x:2x2x1
jax: 0.10.0
libtpu: 0.0.40
codegen_flags: <defaults>
</compile_context>

<pallas_src>
import jax
import jax.numpy as jnp
from jax.experimental import pallas as pl
from jax.experimental.pallas import tpu as pltpu


def _bilinear_upsample_matrix(in_size: int) -> jnp.ndarray:
    """(2*in_size, in_size) matrix M with M @ v == bilinear x2 upsample of v,
    half-pixel centers (PyTorch nn.Upsample(align_corners=False))."""
    out_size = 2 * in_size
    dst = jnp.arange(out_size, dtype=jnp.float32)
    src = (dst + 0.5) / 2.0 - 0.5
    x0 = jnp.floor(src)
    frac = src - x0
    i0 = jnp.clip(x0, 0, in_size - 1).astype(jnp.int32)
    i1 = jnp.clip(x0 + 1, 0, in_size - 1).astype(jnp.int32)
    m = (1.0 - frac)[:, None] * jax.nn.one_hot(i0, in_size, dtype=jnp.float32)
    m = m + frac[:, None] * jax.nn.one_hot(i1, in_size, dtype=jnp.float32)
    return m


def _pick_batch_block(n: int, max_nb: int = 8) -> int:
    """Largest divisor of n that is <= max_nb while keeping >= 2 grid steps
    (both v7x TensorCores get work); amortizes the ~0.35us/step overhead of
    the serial grid on v5e/v6e when N is large."""
    target = max(1, min(max_nb, n // 2))
    for nb in range(target, 0, -1):
        if n % nb == 0:
            return nb
    return 1


# ---------------------------------------------------------------------------
# Main (lane-dense Kronecker) kernel.
# ---------------------------------------------------------------------------
def _skip_upsample_kron_kernel(x_ref, wbd_ref, kt_ref, y_ref, o_ref):
    # x_ref : (nb, Cin, HW)        input block, spatial flattened into lanes
    # wbd_ref: (nb*Cout, nb*Cin)   block-diagonal 1x1-conv weight kron(I, W)
    # kt_ref: (HW, 4HW)            transposed Kronecker upsample matrix
    # y_ref : (nb, Cout, 4HW)      skip block (2H*2W flattened into lanes)
    # o_ref : (nb, Cout, 4HW)
    nb, cin, hw = x_ref.shape
    _, cout, hw4 = y_ref.shape

    x = x_ref[...].astype(jnp.float32).reshape(nb * cin, hw)
    # 1x1 conv FIRST (commutes with the linear upsample; halves the work).
    xr = jnp.dot(wbd_ref[...], x,
                 preferred_element_type=jnp.float32)            # (nb*Cout, HW)
    # Bilinear x2 upsample as one lane-dense matmul against kron(Wh, Ww)^T.
    up = jnp.dot(xr, kt_ref[...],
                 preferred_element_type=jnp.float32)            # (nb*Cout, 4HW)
    out = up.reshape(nb, cout, hw4) + y_ref[...].astype(jnp.float32)
    o_ref[...] = out.astype(o_ref.dtype)


# ---------------------------------------------------------------------------
# Fallback (separable) kernel for large spatial sizes where the Kronecker
# matrix would be too big for VMEM (notably on v7x's 64 MiB).
# ---------------------------------------------------------------------------
def _skip_upsample_sep_kernel(x_ref, wct_ref, wh_ref, ww_ref, y_ref, o_ref):
    x = x_ref[0].astype(jnp.float32)                            # (Cin, H, W)
    # 1x1 conv first.
    xr = jnp.einsum("oc,chw->ohw", wct_ref[...], x,
                    preferred_element_type=jnp.float32)         # (Cout, H, W)
    # Separable bilinear x2 upsample: rows then columns.
    t = jnp.einsum("ph,ohw->opw", wh_ref[...], xr,
                   preferred_element_type=jnp.float32)          # (Cout, 2H, W)
    up = jnp.einsum("opw,qw->opq", t, ww_ref[...],
                    preferred_element_type=jnp.float32)         # (Cout, 2H, 2W)
    o_ref[0] = (up + y_ref[0].astype(jnp.float32)).astype(o_ref.dtype)


def skip_upsample(x, y, conv_weight, *, max_batch_block=8,
                  kron_vmem_limit_bytes=4 * 1024 * 1024):
    """SkipUpSample forward: Conv1x1_nobias(bilinear_up_x2(x)) + y.

    x:           (N, Cin, H, W)     with Cin  = in_channels + s_factor
    y:           (N, Cout, 2H, 2W)  with Cout = in_channels
    conv_weight: (Cout, Cin)        == PyTorch Conv2d weight[:, :, 0, 0]
    """
    N, Cin, H, W = x.shape
    Ny, Cout, H2, W2 = y.shape
    assert Ny == N and H2 == 2 * H and W2 == 2 * W
    assert conv_weight.shape == (Cout, Cin), (
        "conv_weight must be (Cout, Cin), i.e. PyTorch weight[:, :, 0, 0]")

    wh = _bilinear_upsample_matrix(H)   # (2H, H)
    ww = _bilinear_upsample_matrix(W)   # (2W, W)

    hw, hw4 = H * W, 4 * H * W
    itemsize = x.dtype.itemsize
    bytes_accessed = int(x.size * itemsize + y.size * itemsize
                         + N * Cout * hw4 * itemsize)

    if hw * hw4 * 4 <= kron_vmem_limit_bytes:
        # Lane-dense path: two plain 2D MXU matmuls per grid step.
        nb = _pick_batch_block(N, max_batch_block)
        grid = (N // nb,)
        kt = jnp.kron(wh, ww).T                                  # (HW, 4HW)
        wbd = jnp.kron(jnp.eye(nb, dtype=jnp.float32),
                       conv_weight.astype(jnp.float32))          # (nb*Cout, nb*Cin)
        x3 = x.reshape(N, Cin, hw)
        y3 = y.reshape(N, Cout, hw4)
        cost = pl.CostEstimate(
            flops=int(2 * N * (Cout * Cin * hw + Cout * hw * hw4)),
            transcendentals=0, bytes_accessed=bytes_accessed)
        out3 = pl.pallas_call(
            _skip_upsample_kron_kernel,
            out_shape=jax.ShapeDtypeStruct((N, Cout, hw4), x.dtype),
            grid=grid,
            in_specs=[
                pl.BlockSpec((nb, Cin, hw), lambda i: (i, 0, 0)),
                pl.BlockSpec((nb * Cout, nb * Cin), lambda i: (0, 0)),
                pl.BlockSpec((hw, hw4), lambda i: (0, 0)),
                pl.BlockSpec((nb, Cout, hw4), lambda i: (i, 0, 0)),
            ],
            out_specs=pl.BlockSpec((nb, Cout, hw4), lambda i: (i, 0, 0)),
            compiler_params=pltpu.CompilerParams(
                dimension_semantics=("parallel",)),
            cost_estimate=cost,
        )(x3, wbd, kt, y3)
        return out3.reshape(N, Cout, H2, W2)

    # Large-image fallback: separable row/column interpolation (still
    # conv-first), one image per grid step.
    cost = pl.CostEstimate(
        flops=int(2 * N * (Cout * Cin * hw + Cout * H2 * hw + Cout * H2 * W2 * W)),
        transcendentals=0, bytes_accessed=bytes_accessed)
    out = pl.pallas_call(
        _skip_upsample_sep_kernel,
        out_shape=jax.ShapeDtypeStruct((N, Cout, H2, W2), x.dtype),
        grid=(N,),
        in_specs=[
            pl.BlockSpec((1, Cin, H, W), lambda i: (i, 0, 0, 0)),
            pl.BlockSpec((Cout, Cin), lambda i: (0, 0)),
            pl.BlockSpec((H2, H), lambda i: (0, 0)),
            pl.BlockSpec((W2, W), lambda i: (0, 0)),
            pl.BlockSpec((1, Cout, H2, W2), lambda i: (i, 0, 0, 0)),
        ],
        out_specs=pl.BlockSpec((1, Cout, H2, W2), lambda i: (i, 0, 0, 0)),
        compiler_params=pltpu.CompilerParams(
            dimension_semantics=("parallel",)),
        cost_estimate=cost,
    )(x, conv_weight, wh, ww, y)
    return out


if __name__ == "__main__":
    # Module config (small): in_channels=4, s_factor=4.
    in_channels = 4
    s_factor = 4
    N, H, W = 2, 8, 8
    Cin = in_channels + s_factor      # 8
    Cout = in_channels                # 4

    key = jax.random.PRNGKey(0)
    kx, ky, kw = jax.random.split(key, 3)
    x = jax.random.normal(kx, (N, Cin, H, W), dtype=jnp.float32)
    y = jax.random.normal(ky, (N, Cout, 2 * H, 2 * W), dtype=jnp.float32)
    # PyTorch Conv2d(Cin, Cout, 1, bias=False) weight is (Cout, Cin, 1, 1);
    # the wrapper takes weight[:, :, 0, 0] -> (Cout, Cin).
    conv_weight = (jax.random.normal(kw, (Cout, Cin), dtype=jnp.float32)
                   * (1.0 / jnp.sqrt(Cin)))

    out = jax.block_until_ready(skip_upsample(x, y, conv_weight))

    # Pure-JAX reference: bilinear x2 (half-pixel centers == PyTorch
    # align_corners=False), then 1x1 conv (no bias) + skip.
    up_ref = jax.image.resize(x, (N, Cin, 2 * H, 2 * W), method="bilinear",
                              antialias=False)
    ref = jnp.einsum("oc,ncpq->nopq", conv_weight, up_ref) + y
    assert out.shape == (N, Cout, 2 * H, 2 * W)
    assert jnp.allclose(out, ref, atol=1e-4, rtol=1e-4)

    # Also exercise the separable fallback path (used when the Kronecker
    # upsample matrix would be too large for VMEM, e.g. big images on v7x).
    out_sep = jax.block_until_ready(
        skip_upsample(x, y, conv_weight, kron_vmem_limit_bytes=0))
    assert jnp.allclose(out_sep, ref, atol=1e-4, rtol=1e-4)

    print("KERNEL_OK")
</pallas_src>

<mosaic_0001>
module attributes {stable_mosaic.version = 11 : i64} {
  func.func @_skip_upsample_kron_kernel(%arg0: i32, %arg1: memref<1x8x64xf32, #tpu.memory_space<vmem>>, %arg2: memref<4x8xf32, #tpu.memory_space<vmem>>, %arg3: memref<64x256xf32, #tpu.memory_space<vmem>>, %arg4: memref<1x4x256xf32, #tpu.memory_space<vmem>>, %arg5: memref<1x4x256xf32, #tpu.memory_space<vmem>>) attributes {dimension_semantics = [#tpu.dimension_semantics<parallel>], iteration_bounds = array<i64: 2>, scalar_prefetch = 0 : i64, scratch_operands = 0 : i64, tpu.core_type = #tpu.core_type<tc>, window_params = [{transform_indices = @transform_0, window_bounds = array<i64: 1, 8, 64>}, {pipeline_mode = #tpu.pipeline_mode<synchronous>, transform_indices = @transform_1, window_bounds = array<i64: 4, 8>}, {pipeline_mode = #tpu.pipeline_mode<synchronous>, transform_indices = @transform_2, window_bounds = array<i64: 64, 256>}, {transform_indices = @transform_3, window_bounds = array<i64: 1, 4, 256>}, {transform_indices = @transform_4, window_bounds = array<i64: 1, 4, 256>}]} {
    %c0 = arith.constant 0 : index
    %c0_0 = arith.constant 0 : index
    %c0_1 = arith.constant 0 : index
    %0 = vector.load %arg1[%c0, %c0_0, %c0_1] : memref<1x8x64xf32, #tpu.memory_space<vmem>>, vector<1x8x64xf32>
    %1 = vector.shape_cast %0 : vector<1x8x64xf32> to vector<8x64xf32>
    %c0_2 = arith.constant 0 : index
    %c0_3 = arith.constant 0 : index
    %2 = vector.load %arg2[%c0_2, %c0_3] : memref<4x8xf32, #tpu.memory_space<vmem>>, vector<4x8xf32>
    %cst = arith.constant dense<0.000000e+00> : vector<4x64xf32>
    %3 = tpu.matmul %2, %1, %cst {dimension_numbers = #tpu.dot_dimension_numbers<[1], [0], [0], [1], [0, 0, 1, 1], [], []>} : vector<4x8xf32>, vector<8x64xf32>, vector<4x64xf32> -> vector<4x64xf32>
    %c0_4 = arith.constant 0 : index
    %c0_5 = arith.constant 0 : index
    %4 = vector.load %arg3[%c0_4, %c0_5] : memref<64x256xf32, #tpu.memory_space<vmem>>, vector<64x256xf32>
    %cst_6 = arith.constant dense<0.000000e+00> : vector<4x256xf32>
    %5 = tpu.matmul %3, %4, %cst_6 {dimension_numbers = #tpu.dot_dimension_numbers<[1], [0], [0], [1], [0, 0, 1, 1], [], []>} : vector<4x64xf32>, vector<64x256xf32>, vector<4x256xf32> -> vector<4x256xf32>
    %6 = vector.shape_cast %5 : vector<4x256xf32> to vector<1x4x256xf32>
    %c0_7 = arith.constant 0 : index
    %c0_8 = arith.constant 0 : index
    %c0_9 = arith.constant 0 : index
    %7 = vector.load %arg4[%c0_7, %c0_8, %c0_9] : memref<1x4x256xf32, #tpu.memory_space<vmem>>, vector<1x4x256xf32>
    %8 = arith.addf %6, %7 : vector<1x4x256xf32>
    %c0_10 = arith.constant 0 : index
    %c0_11 = arith.constant 0 : index
    %c0_12 = arith.constant 0 : index
    %9 = vector.load %arg5[%c0_10, %c0_11, %c0_12] : memref<1x4x256xf32, #tpu.memory_space<vmem>>, vector<1x4x256xf32>
    tpu.vector_store %arg5[%c0_10, %c0_11, %c0_12], %8 {strides = array<i32>} : memref<1x4x256xf32, #tpu.memory_space<vmem>>, vector<1x4x256xf32>,
    return
  }
  func.func @transform_0(%arg0: i32) -> (i32, i32, i32) {
    %c0_i32 = arith.constant 0 : i32
    %c0_i32_0 = arith.constant 0 : i32
    %c0_i32_1 = arith.constant 0 : i32
    return %arg0, %c0_i32, %c0_i32_0 : i32, i32, i32
  }
  func.func @transform_1(%arg0: i32) -> (i32, i32) {
    %c0_i32 = arith.constant 0 : i32
    %c0_i32_0 = arith.constant 0 : i32
    %c0_i32_1 = arith.constant 0 : i32
    return %c0_i32, %c0_i32_0 : i32, i32
  }
  func.func @transform_2(%arg0: i32) -> (i32, i32) {
    %c0_i32 = arith.constant 0 : i32
    %c0_i32_0 = arith.constant 0 : i32
    %c0_i32_1 = arith.constant 0 : i32
    return %c0_i32, %c0_i32_0 : i32, i32
  }
  func.func @transform_3(%arg0: i32) -> (i32, i32, i32) {
    %c0_i32 = arith.constant 0 : i32
    %c0_i32_0 = arith.constant 0 : i32
    %c0_i32_1 = arith.constant 0 : i32
    return %arg0, %c0_i32, %c0_i32_0 : i32, i32, i32
  }
  func.func @transform_4(%arg0: i32) -> (i32, i32, i32) {
    %c0_i32 = arith.constant 0 : i32
    %c0_i32_0 = arith.constant 0 : i32
    %c0_i32_1 = arith.constant 0 : i32
    return %arg0, %c0_i32, %c0_i32_0 : i32, i32, i32
  }
}

</mosaic_0001>

<bundles_post_ra>
// kernel: tpu_custom_call.1
= control target key start
LH: loop header
LB: loop body
LE: loop exit
PB: predicated region body
PF: predicated region fallthrough
CT: control target
= control target key end

     0   :  { %s1201_s0 = inlined_call_operand.hbm [shape: f32[2,8,64], index: 0, kind: input, shape index: {}]   ;;  %s1202_s1 = inlined_call_operand.hbm [shape: f32[4,8], index: 1, kind: input, shape index: {}]   ;;  %s1203_s2 = inlined_call_operand.hbm [shape: f32[64,256], index: 2, kind: input, shape index: {}]   ;;  %s1204_s3 = inlined_call_operand.hbm [shape: f32[2,4,256], index: 3, kind: input, shape index: {}]   ;;  %s1205_s4 = inlined_call_operand.hbm [shape: f32[2,4,256], index: 4, kind: output, shape index: {}]  }
   0x1   :  { %1211 = sst [smem:[#allocation15_spill]] %s1201_s0 }
   0x2   :  { %9 = vsyncpa [#allocation3], 0 }
   0x3   :  { %11 = vsyncpa [#allocation3 + $0x1], 0 }
   0x4   :  { %12 = vsyncpa [#allocation6], 0 }
   0x5   :  { %13 = vsyncpa [#allocation9], 0 }
   0x6   :  { %15 = vsyncpa [#allocation9 + $0x1], 0 }
   0x7   :  { %16 = vsyncpa [#allocation4], 0 }
   0x8   :  { %18 = vsyncpa [#allocation4 + $0x1], 0  ;;  %s934_s15 = smov 0   ;;  %s936_s16 = smov 0  }
   0x9   :  { %s938_s17 = smov 0   ;;  %s940_s18 = smov 0  }
   0xa LB: > { %s955_s19 = sadd.s32 4294967295, %s898_s18   ;;  %s583_s20 = sadd.s32 4294967294, %s898_s18   ;;  %s898_s18 = sphi %s940_s18, %s1231_s18   ;;  %s894_s17 = sphi %s938_s17, %s1230_s17   ;;  %s890_s16 = sphi %s936_s16, %s1229_s16   ;;  %s886_s15 = sphi %s934_s15, %s1228_s15  }
   0xb   : > { %p44_p0 = scmp.ne.s32.totalorder %s890_s16, %s886_s15  ;;  %p1206_p1 = scmp.eq.s32.totalorder %s955_s19, 0 }
   0xc   : > { %p142_p3 = scmp.eq.s32.totalorder %s583_s20, 1  ;;  %p584_p5 = scmp.ge.s32.totalorder %s898_s18, 1 }
   0xd   : > { %p964_p4 = por %p1206_p1, %p44_p0  ;;  %p149_p7 = scmp.lt.s32.totalorder %s898_s18, 3 }
   0xe   : > { %p969_p6 = por %p142_p3, %p44_p0  ;;  %s900_s24 = smov [#allocation5]  }
   0xf   : > { %s1212_s21 = scalar_select %p964_p4, 1, 0 }
  0x10   : > { %s1213_s22 = scalar_select %p969_p6, 1, 0 }
  0x11   : > { %p974_p8 = pnand %p584_p5, %p149_p7  ;;  %s162_s25 = sshll.u32 %s900_s24, 4  ;;  %s163_s25 = int_to_ptr.vmem [resolvable:$true] %s162_s25 }
  0x12   : > { %s901_s26 = smov [#allocation7]   ;;  %s708_s5 = scalar_lea.hbm %s1202_s1, 64 }
  0x13   : > { %s1214_s23 = scalar_select %p974_p8, 1, 0 }
  0x14   : > { %p645_p10 = pneg %p974_p8  ;;  %s172_s27 = sshll.u32 %s901_s26, 4  ;;  %s987_s27 = int_to_ptr.vmem [resolvable:$true] %s172_s27 }
  0x15   : > { %p709_p12 = scmp.ne.s32.totalorder %s1202_s1, %s708_s5  ;;  %p715_p5 = scmp.lt.u32.totalorder %s708_s5, %s1202_s1 }
  0x16   : > { %p983_p11 = pnand %p645_p10, %p1206_p1 }
  0x18   : > { %p710_p13 = pneg %p983_p11 }
  0x1a   : > { %p711_p0 = pnand %p710_p13, %p709_p12 }
  0x1c   : > { %p712_p3 = pneg %p711_p0 }
  0x1e   : > { %p717_p7 = pnand %p715_p5, %p712_p3 }
  0x20   : > { %720 = shalt.err (!%p717_p7)
}
  0x21   : > { %s721_s10 = scalar_lea.vmem %s163_s25, 64  ;;  %p729_p2 = scmp.lt.s32.totalorder %s163_s25, %s163_s25 }
  0x22   : > { %p722_p10 = scmp.ne.s32.totalorder %s163_s25, %s721_s10  ;;  %p730_p6 = scmp.lt.s32.totalorder %s721_s10, %s721_s10 }
  0x24   : > { %p724_p9 = pnand %p722_p10, %p710_p13  ;;  %p731_p4 = por %p730_p6, %p729_p2 }
  0x26   : > { %p725_p1 = pneg %p724_p9 }
  0x28   : > { %p732_p8 = pnand %p731_p4, %p725_p1 }
  0x2a   : > { %735 = shalt.err (!%p732_p8)
}
  0x2b   : > { %648 = dma.hbm_to_vmem [thread:$0]  (!%p983_p11), %s1202_s1, 64, %s163_s25, [#allocation6]  }
  0x2c   : > { %s736_s20 = scalar_lea.hbm %s1203_s2, 2048 }
  0x2d   : > { %p737_p9 = scmp.ne.s32.totalorder %s1203_s2, %s736_s20  ;;  %p743_p4 = scmp.lt.u32.totalorder %s736_s20, %s1203_s2 }
  0x2f   : > { %p739_p2 = pnand %p737_p9, %p710_p13 }
  0x31   : > { %p740_p1 = pneg %p739_p2 }
  0x33   : > { %p745_p6 = pnand %p743_p4, %p740_p1 }
  0x35   : > { %748 = shalt.err (!%p745_p6)
}
  0x36   : > { %s749_s25 = scalar_lea.vmem %s987_s27, 2048  ;;  %p757_p3 = scmp.lt.s32.totalorder %s987_s27, %s987_s27 }
  0x37   : > { %p750_p8 = scmp.ne.s32.totalorder %s987_s27, %s749_s25  ;;  %p758_p5 = scmp.lt.s32.totalorder %s749_s25, %s749_s25 }
  0x39   : > { %p752_p12 = pnand %p750_p8, %p710_p13  ;;  %p759_p7 = por %p758_p5, %p757_p3 }
  0x3b   : > { %p753_p0 = pneg %p752_p12 }
  0x3d   : > { %p760_p10 = pnand %p759_p7, %p753_p0 }
  0x3f   : > { %763 = shalt.err (!%p760_p10)
}
  0x40   : > { %s902_s5 = smov 256   ;;  %s903_s6 = smov 16  }
  0x41   : > { %651 = dma.hbm_to_vmem [thread:$0]  (!%p983_p11), %s1203_s2, 2048, %s987_s27, [#allocation6], %s902_s5, %s902_s5, %s903_s6  }
  0x42   : > { %s1037_s9 = sadd.s32 1, %s898_s18   ;;  %s31_s10 = sadd.s32 1, %s894_s17 }
  0x43   : > { %s28_s11 = ssub.s32 %s898_s18, %s1037_s9  ;;  %p38_p13 = scmp.ne.s32.totalorder %s894_s17, %s890_s16 }
  0x44   : > { %p29_p9 = scmp.eq.s32.totalorder %s28_s11, 0  ;;  %p39_p2 = scmp.eq.s32.totalorder %s898_s18, 0 }
  0x45   : > { %p1216_p1 = scmp.eq.s32.totalorder %s955_s19, 1  ;;  %p665_p6 = scmp.lt.s32.totalorder %s898_s18, 2 }
  0x46   : > { %s1053_s13 = scalar_select %p29_p9, %s894_s17, %s31_s10  }
  0x47   : > { %p1047_p4 = por %p1216_p1, %p38_p13  ;;  %p40_p8 = por %p39_p2, %p38_p13 }
  0x48   : > { %s1056_s28 = sand.u32 1, %s894_s17   ;;  %s589_s14 = sshll.u32 %s898_s18, 7 }
  0x49   : > { %s1217_s12 = scalar_select %p1047_p4, 1, 0 }
  0x4a   : > { %s1209_s27 = sshll.u32 %s1056_s28, 3  ;;  %s1218_s0 = sld [smem:[#allocation15_spill]] }
  0x4b   : > { %s190_s29 = scalar_lea.vmem [#allocation2], %s1209_s27  ;;  %p1069_p11 = pnand %p665_p6, %p40_p8 }
  0x4c   : > { %s197_s30 = sshll.u32 %s190_s29, 4  ;;  %s1076_s7 = scalar_lea.hbm %s1204_s3, %s589_s14  ;;  %s1067_s30 = int_to_ptr.vmem [resolvable:$true] %s197_s30 }
  0x4d   : > { %s187_s8 = scalar_lea.sflag [#allocation3], %s1056_s28  ;;  %p766_p0 = pneg %p1069_p11 }
  0x50   : > { %s1063_s26 = scalar_lea.hbm %s1218_s0, %s589_s14  ;;  %s769_s24 = scalar_lea.hbm %s1218_s0, 256 }
  0x51   : > { %s764_s10 = scalar_lea.hbm %s1063_s26, 128  ;;  %p770_p7 = scmp.lt.u32.totalorder %s1063_s26, %s1218_s0 }
  0x52   : > { %p765_p12 = scmp.ne.s32.totalorder %s1063_s26, %s764_s10  ;;  %p771_p10 = scmp.lt.u32.totalorder %s769_s24, %s764_s10 }
  0x53   : > { %p773_p9 = scmp.lt.u32.totalorder %s764_s10, %s1063_s26 }
  0x54   : > { %p767_p3 = pnand %p766_p0, %p765_p12  ;;  %p772_p13 = por %p771_p10, %p770_p7 }
  0x56   : > { %p768_p5 = pneg %p767_p3  ;;  %p774_p2 = por %p773_p9, %p772_p13 }
  0x58   : > { %p775_p1 = pnand %p774_p2, %p768_p5 }
  0x5a   : > { %778 = shalt.err (!%p775_p1)
}
  0x5b   : > { %s779_s14 = scalar_lea.vmem %s1067_s30, 128  ;;  %s904_s5 = smov [#allocation2]  }
  0x5c   : > { %p780_p6 = scmp.ne.s32.totalorder %s1067_s30, %s779_s14  ;;  %s784_s6 = sshll.u32 %s904_s5, 4  ;;  %s785_s6 = int_to_ptr.vmem [resolvable:$false] %s784_s6 }
  0x5d   : > { %s786_s27 = scalar_lea.vmem %s785_s6, 256  ;;  %p787_p3 = scmp.lt.s32.totalorder %s1067_s30, %s785_s6 }
  0x5e   : > { %p782_p8 = pnand %p780_p6, %p766_p0  ;;  %p788_p7 = scmp.lt.s32.totalorder %s786_s27, %s779_s14 }
  0x60   : > { %p783_p12 = pneg %p782_p8  ;;  %p789_p10 = por %p788_p7, %p787_p3 }
  0x62   : > { %p790_p13 = pnand %p789_p10, %p783_p12 }
  0x64   : > { %793 = shalt.err (!%p790_p13)
}
  0x65   : > { %655 = dma.hbm_to_vmem [thread:$0]  (!%p1069_p11), %s1063_s26, 128, %s1067_s30, %s187_s8  }
  0x66   : > { %s1220_s10 = sshll.u32 %s1056_s28, 3  ;;  %s205_s24 = scalar_lea.sflag [#allocation9], %s1056_s28 }
  0x67   : > { %s208_s11 = scalar_lea.vmem [#allocation8], %s1220_s10  ;;  %s794_s29 = scalar_lea.hbm %s1076_s7, 128 }
  0x68   : > { %s216_s20 = sshll.u32 %s208_s11, 4  ;;  %p795_p5 = scmp.ne.s32.totalorder %s1076_s7, %s794_s29  ;;  %s217_s20 = int_to_ptr.vmem [resolvable:$true] %s216_s20 }
  0x69   : > { %s799_s6 = scalar_lea.hbm %s1204_s3, 256  ;;  %p800_p1 = scmp.lt.u32.totalorder %s1076_s7, %s1204_s3 }
  0x6a   : > { %p797_p9 = pnand %p795_p5, %p766_p0  ;;  %p801_p6 = scmp.lt.u32.totalorder %s799_s6, %s794_s29 }
  0x6b   : > { %p803_p12 = scmp.lt.u32.totalorder %s794_s29, %s1076_s7 }
  0x6c   : > { %p798_p2 = pneg %p797_p9  ;;  %p802_p8 = por %p801_p6, %p800_p1 }
  0x6e   : > { %p804_p3 = por %p803_p12, %p802_p8 }
  0x70   : > { %p805_p7 = pnand %p804_p3, %p798_p2 }
  0x72   : > { %808 = shalt.err (!%p805_p7)
}
  0x73   : > { %s809_s28 = scalar_lea.vmem %s217_s20, 128  ;;  %s905_s26 = smov [#allocation8]  }
  0x74   : > { %p810_p10 = scmp.ne.s32.totalorder %s217_s20, %s809_s28  ;;  %s814_s30 = sshll.u32 %s905_s26, 4  ;;  %s815_s30 = int_to_ptr.vmem [resolvable:$false] %s814_s30 }
  0x75   : > { %s816_s8 = scalar_lea.vmem %s815_s30, 256  ;;  %p817_p9 = scmp.lt.s32.totalorder %s217_s20, %s815_s30 }
  0x76   : > { %p812_p13 = pnand %p810_p10, %p766_p0  ;;  %p818_p4 = scmp.lt.s32.totalorder %s816_s8, %s809_s28 }
  0x78   : > { %p813_p5 = pneg %p812_p13  ;;  %p819_p1 = por %p818_p4, %p817_p9 }
  0x7a   : > { %p820_p6 = pnand %p819_p1, %p813_p5 }
  0x7c   : > { %823 = shalt.err (!%p820_p6)
}
  0x7d   : > { %658 = dma.hbm_to_vmem [thread:$0]  (!%p1069_p11), %s1076_s7, 128, %s217_s20, %s205_s24  }
  0x7e   : > { %p1221_p2 = scmp.ne.s32.totalorder %s1214_s23, 0 }
  0x7f   : > { %s1129_s0 = sand.u32 (!%p1221_p2), 1, %s890_s16   ;;  %p1222_p4 = scmp.ne.s32.totalorder (!%p1221_p2), %s1212_s21, 0 }
  0x80   : > { %225 = sbr.rel (%p1221_p2) target bundleno = 588 (0x24c), region = 36  ;;  %s1132_s10 = sshll.u32 (!%p1221_p2), %s1129_s0, 3 }
  0x81   : > { %s228_s11 = scalar_lea.sflag (!%p1221_p2), [#allocation3], %s1129_s0  ;;  %s231_s29 = scalar_lea.vmem (!%p1221_p2), [#allocation2], %s1132_s10 }
  0x87   : > { %869 = dma.done.wait (%p1222_p4), %s228_s11, 128  }
  0x88   : > { %871 = vsyncadd (%p1222_p4), %s228_s11, 4294967168  ;;  %p1223_p11 = scmp.eq.s32.totalorder %s955_s19, 0 }
  0x8a   : > { %873 = dma.done.wait (%p1223_p11), [#allocation6], 2112   ;;  %p1224_p0 = pmov %p1223_p11 }
  0x8b   : > { %s245_s23 = scalar_lea.sflag [#allocation9], %s1129_s0  ;;  %s248_s25 = scalar_lea.vmem [#allocation8], %s1132_s10 }
  0x8c   : > { %875 = vsyncadd (%p1224_p0), [#allocation6], 4294965184 }
  0x8d   : > { %877 = dma.done.wait (%p1222_p4), %s245_s23, 128  }
  0x8e   : > { %879 = vsyncadd (%p1222_p4), %s245_s23, 4294967168  ;;  %v906_v0 = vmov 0.0   ;;  %vm907_vm0 = vmmov 0   ;;  %vm280_vm1 = vcmask 64512   ;;  %v278_v1 = vld [vmem:[%s231_s29] sm:$0xff]  ;;  %v354_v5 = vld [vmem:[#allocation7] sm:$0xff] }
  0x8f   : > { %610 = vmatprep.subr.mxu0 %v906_v0  ;;  %612 = vmatprep.mubr.msk.f32.mxu0 %vm907_vm0, %v906_v0  ;;  %v279_v2 = vld [vmem:[#allocation5] sm:$0xf]  ;;  %v355_v3 = vld [vmem:[#allocation7 + $0x8] sm:$0xff]  ;;  %v356_v6 = vld [vmem:[#allocation7 + $0x10] sm:$0xff]  ;;  %vm370_vm2 = vcmask 523264   ;;  %s607_s21 = sshll.u32 %s955_s19, 7 }
  0x90   : > { %438 = vmatprep.mubr.f32.mxu1 %v906_v0  ;;  %611 = vmatpush3.msra.mxu0 %v278_v1  ;;  %v357_v4 = vld [vmem:[#allocation7 + $0x18] sm:$0xff]  ;;  %v617_v8 = vpack.c.bf16 %v356_v6, %v354_v5  ;;  %v359_v9 = vld [vmem:[#allocation7 + $0x28] sm:$0xff]  ;;  %v358_v11 = vld [vmem:[#allocation7 + $0x20] sm:$0xff]  ;;  %s277_s7 = scalar_lea.vmem [#allocation10], %s1132_s10  ;;  %s1157_s5 = scalar_lea.hbm %s1205_s4, %s607_s21 }
  0x91   : > { %613 = vmatmul.mubr.msk.f32.vlgmr.msra.gmra.mrb[0].mxu0 %vm280_vm1, %v279_v2  ;;  %v615_v7 = vpack.c.bf16 %v357_v4, %v355_v3  ;;  %v361_v10 = vld [vmem:[#allocation7 + $0x38] sm:$0xff]  ;;  %v360_v13 = vld [vmem:[#allocation7 + $0x30] sm:$0xff]  ;;  %v363_v14 = vld [vmem:[#allocation7 + $0x48] sm:$0xff]  ;;  %s471_s20 = sshll.u32 %s277_s7, 4  ;;  %s457_s6 = scalar_lea.sflag [#allocation4], %s1129_s0  ;;  %s1159_s20 = int_to_ptr.vmem [resolvable:$true] %s471_s20 }
  0x92   : > { %v619_v12 = vpack.c.bf16 %v361_v10, %v359_v9  ;;  %v365_v15 = vld [vmem:[#allocation7 + $0x58] sm:$0xff]  ;;  %v621_v16 = vpack.c.bf16 %v360_v13, %v358_v11  ;;  %v362_v18 = vld [vmem:[#allocation7 + $0x40] sm:$0xff]  ;;  %v364_v19 = vld [vmem:[#allocation7 + $0x50] sm:$0xff]  ;;  %s824_s27 = scalar_lea.vmem %s1159_s20, 128  ;;  %p1225_p12 = scmp.ne.s32.totalorder %s1217_s12, 0 }
  0x93   : > { %616 = vmatprep.subr.bf16.mxu1 %v615_v7  ;;  %v623_v17 = vpack.c.bf16 %v365_v15, %v363_v14  ;;  %v367_v20 = vld [vmem:[#allocation7 + $0x68] sm:$0xff]  ;;  %v369_v21 = vld [vmem:[#allocation7 + $0x78] sm:$0xff]  ;;  %v625_v22 = vpack.c.bf16 %v364_v19, %v362_v18  ;;  %v366_v24 = vld [vmem:[#allocation7 + $0x60] sm:$0xff]  ;;  %p825_p8 = scmp.ne.s32.totalorder %s1159_s20, %s824_s27  ;;  %s908_s19 = smov [#allocation10]  }
  0x94   : > { %618 = vmatpush1.bf16.msra.mxu1 %v617_v8  ;;  %v627_v23 = vpack.c.bf16 %v369_v21, %v367_v20  ;;  %v368_v25 = vld [vmem:[#allocation7 + $0x70] sm:$0xff]  ;;  %v445_v29 = vld [vmem:[%s248_s25] sm:$0xff]  ;;  %s828_s28 = sshll.u32 %s908_s19, 4  ;;  %s829_s28 = int_to_ptr.vmem [resolvable:$false] %s828_s28 }
  0x95   : > { %620 = vmatprep.subr.bf16.mxu1 %v619_v12  ;;  %v629_v26 = vpack.c.bf16 %v368_v25, %v366_v24  ;;  %v447_v30 = vcombine.high %v445_v29, %v445_v29  ;;  %p826_p3 = pnand %p825_p8, %p1225_p12  ;;  %s830_s26 = scalar_lea.vmem %s829_s28, 256 }
  0x96   : > { %p831_p10 = scmp.lt.s32.totalorder %s1159_s20, %s829_s28  ;;  %p832_p13 = scmp.lt.s32.totalorder %s830_s26, %s824_s27 }
  0x97   : > { %p827_p7 = pneg %p826_p3 }
  0x98   : > { %622 = vmatpush1.bf16.msra.mxu1 %v621_v16  ;;  %p833_p5 = por %p832_p13, %p831_p10 }
  0x99   : > { %624 = vmatprep.subr.bf16.mxu1 %v623_v17 }
  0x9a   : > { %p834_p9 = pnand %p833_p5, %p827_p7 }
  0x9c   : > { %626 = vmatpush1.bf16.msra.mxu1 %v625_v22 }
  0x9d   : > { %628 = vmatprep.subr.bf16.mxu1 %v627_v23 }
  0xa0   : > { %630 = vmatpush1.bf16.msra.mxu1 %v629_v26 }
 0x164   : > { %v350_v27 = vpop.f32.mrb[0].mxu0 }
 0x165   : > { %v614_v28 = vpop.f32.mrb[1].mxu0  ;;  %600 = vmatmul.mubr.msk.f32.vlgmr.msra.gmra.mrb[0].mxu1 %vm370_vm2, %v350_v27 }
 0x238   : > { %v440_v31 = vpop.f32.mrb[0].mxu1 }
 0x239   : > { %v449_v32 = vadd.f32 %v445_v29, %v440_v31  ;;  %v442_v33 = vpop.f32.mrb[1].mxu1 }
 0x23a   : > { %v450_v34 = vadd.f32 %v447_v30, %v442_v33 }
 0x23c   : > { %v453_v35 = vcombine.low %v449_v32, %v450_v34 }
 0x23e   : > { %455 = vst [vmem:[%s277_s7] sm:$0xff] %v453_v35 }
 0x23f   : > { %837 = shalt.err (!%p834_p9)
}
 0x240   : > { %s838_s30 = scalar_lea.hbm %s1157_s5, 128  ;;  %s842_s10 = scalar_lea.hbm %s1205_s4, 256 }
 0x241   : > { %p839_p1 = scmp.ne.s32.totalorder %s1157_s5, %s838_s30  ;;  %p843_p4 = scmp.lt.u32.totalorder %s1157_s5, %s1205_s4 }
 0x242   : > { %p844_p11 = scmp.lt.u32.totalorder %s842_s10, %s838_s30  ;;  %p846_p8 = scmp.lt.u32.totalorder %s838_s30, %s1157_s5 }
 0x243   : > { %p840_p6 = pnand %p839_p1, %p1225_p12 }
 0x244   : > { %p845_p0 = por %p844_p11, %p843_p4 }
 0x245   : > { %p841_p2 = pneg %p840_p6 }
 0x246   : > { %p847_p3 = por %p846_p8, %p845_p0 }
 0x248   : > { %p848_p7 = pnand %p847_p3, %p841_p2 }
 0x24a   : > { %851 = shalt.err (!%p848_p7)
}
 0x24b   : > { %643 = dma.vmem_to_hbm [thread:$0]  (%p1225_p12), %s1159_s20, 128, %s1157_s5, %s457_s6  }
 0x24c PF: > { %s483_s23 = sand.u32 1, %s886_s15   ;;  %p1226_p10 = scmp.ne.s32.totalorder %s1213_s22, 0 }
 0x24d   : > { %p1227_p13 = scmp.ge.s32.totalorder %s898_s18, 2  ;;  %s484_s25 = scalar_lea.sflag [#allocation4], %s483_s23 }
 0x24f   : > { %p660_p5 = pnand %p1227_p13, %p1226_p10 }
 0x251   : > { %881 = dma.done.wait (!%p660_p5), %s484_s25, 128  }
 0x252   : > { %883 = vsyncadd (!%p660_p5), %s484_s25, 4294967168  ;;  %p21_p9 = scmp.ge.s32.totalorder %s1037_s9, 4   ;;  %s1228_s15 = smov %s890_s16 }
 0x253   : > { %s1229_s16 = smov %s894_s17  ;;  %s1230_s17 = smov %s1053_s13 }
 0x254   : > { %s1231_s18 = smov %s1037_s9  ;;  %23 = sbr.rel (!%p21_p9) target bundleno = 10 (0xa), region = 102 }
 0x25b   :  { %489 = vsyncpa [#allocation3], 1 }
 0x25c   :  { %491 = vsyncpa [#allocation3 + $0x1], 1 }
 0x25d   :  { %492 = vsyncpa [#allocation6], 1 }
 0x25e   :  { %493 = vsyncpa [#allocation9], 1 }
 0x25f   :  { %495 = vsyncpa [#allocation9 + $0x1], 1 }
 0x260   :  { %496 = vsyncpa [#allocation4], 1 }
 0x261   :  { %498 = vsyncpa [#allocation4 + $0x1], 1 }

</bundles_post_ra>
